<compile_context>
chip_gen: v6e
topology: v6e:2x2x1
jax: 0.10.0
libtpu: 0.0.40
codegen_flags: <defaults>
</compile_context>

<pallas_src>
import math
import jax
import jax.numpy as jnp
from jax.experimental import pallas as pl
from jax.experimental.pallas import tpu as pltpu


def make_positional_encoding(d_model: int, max_len: int) -> jnp.ndarray:
    """Deterministic sinusoidal table, identical to the PyTorch __init__."""
    position = jnp.arange(0, max_len, dtype=jnp.float32)[:, None]             # (max_len, 1)
    div_term = jnp.exp(
        jnp.arange(0, d_model, 2, dtype=jnp.float32) * -(math.log(10000.0) / d_model)
    )                                                                          # (d_model//2,)
    enc = jnp.zeros((max_len, d_model), dtype=jnp.float32)
    enc = enc.at[:, 0::2].set(jnp.sin(position * div_term))
    enc = enc.at[:, 1::2].set(jnp.cos(position * div_term))
    return enc                                                                 # (max_len, d_model)


def _add_kernel(x_ref, enc_ref, o_ref):
    # Pure VPU elementwise add. enc broadcasts over the leading (sublane) dim
    # when its block has fewer rows than x's block.
    o_ref[...] = (x_ref[...] + enc_ref[...]).astype(o_ref.dtype)


# Double-buffered working-set budget (2x x + 2x enc + 2x out tiles).
# Safe under default scoped VMEM on v5e (16 MiB) / v6e (32 MiB) / v7x (32 MiB).
_VMEM_WORKING_SET_BUDGET = 8 * 1024 * 1024


def _sublane_min(itemsize: int) -> int:
    # f32 -> 8, bf16/f16 -> 16, int8/fp8 -> 32
    return {4: 8, 2: 16, 1: 32}.get(itemsize, 8)


def positional_encoding_forward(x: jnp.ndarray, encoding: jnp.ndarray) -> jnp.ndarray:
    """x: (B, S, D); encoding: (max_len, D). Returns x + encoding[None, :S, :]."""
    B, S, D = x.shape
    max_len, d_model = encoding.shape
    assert D == d_model, f"d_model mismatch: x has {D}, encoding has {d_model}"
    assert S <= max_len, f"sequence length {S} exceeds max_len {max_len}"

    enc_s = encoding[:S, :].astype(x.dtype)                    # (S, D), same dtype as x
    itemsize = int(jnp.dtype(x.dtype).itemsize)
    smin = _sublane_min(itemsize)
    cost = pl.CostEstimate(
        flops=int(B * S * D),
        transcendentals=0,
        bytes_accessed=int(3 * B * S * D * itemsize),
    )

    # ---- Layout 1: D already lane-dense -> (B*S, D) row tiling. --------------
    if D % 128 == 0 and S % smin == 0:
        cap = max(smin, _VMEM_WORKING_SET_BUDGET // (6 * D * itemsize))
        tr = smin
        for cand in range(smin, S + 1, smin):                  # largest divisor of S
            if S % cand == 0 and cand <= cap:                  # that fits the budget
                tr = cand
        ns = S // tr
        x2 = x.reshape(B * S, D)
        out2 = pl.pallas_call(
            _add_kernel,
            out_shape=jax.ShapeDtypeStruct((B * S, D), x.dtype),
            grid_spec=pltpu.PrefetchScalarGridSpec(
                num_scalar_prefetch=0,
                grid=(B, ns),
                in_specs=[
                    pl.BlockSpec((tr, D), lambda b, s: (b * ns + s, 0)),
                    pl.BlockSpec((tr, D), lambda b, s: (s, 0)),
                ],
                out_specs=pl.BlockSpec((tr, D), lambda b, s: (b * ns + s, 0)),
            ),
            compiler_params=pltpu.CompilerParams(
                dimension_semantics=("parallel", "parallel")),
            cost_estimate=cost,
        )(x2, enc_s)
        return out2.reshape(B, S, D)

    # ---- Layout 2: small D -> flatten (S, D) to S*D for a lane-dense output. --
    if (S * D) % 128 == 0:
        total = S * D
        cap = max(128, _VMEM_WORKING_SET_BUDGET // ((4 * B + 2) * itemsize))
        cap = min(total, (cap // 128) * 128)
        tc = 128                                               # 128 always divides total
        for cand in range(cap, 127, -128):                     # largest 128-multiple
            if total % cand == 0:                              # dividing total & in budget
                tc = cand
                break
        nc = total // tc
        x2 = x.reshape(B, total)
        enc2 = enc_s.reshape(1, total)
        out2 = pl.pallas_call(
            _add_kernel,
            out_shape=jax.ShapeDtypeStruct((B, total), x.dtype),
            grid_spec=pltpu.PrefetchScalarGridSpec(
                num_scalar_prefetch=0,
                grid=(nc,),
                in_specs=[
                    pl.BlockSpec((B, tc), lambda c: (0, c)),
                    pl.BlockSpec((1, tc), lambda c: (0, c)),
                ],
                out_specs=pl.BlockSpec((B, tc), lambda c: (0, c)),
            ),
            compiler_params=pltpu.CompilerParams(
                dimension_semantics=("parallel",)),
            cost_estimate=cost,
        )(x2, enc2)
        return out2.reshape(B, S, D)

    # ---- Fallback: awkward shapes; full (S, D) block per batch element. -------
    return pl.pallas_call(
        _add_kernel,
        out_shape=jax.ShapeDtypeStruct((B, S, D), x.dtype),
        grid_spec=pltpu.PrefetchScalarGridSpec(
            num_scalar_prefetch=0,
            grid=(B,),
            in_specs=[
                pl.BlockSpec((None, S, D), lambda b: (b, 0, 0)),   # batch dim squeezed
                pl.BlockSpec((S, D), lambda b: (0, 0)),
            ],
            out_specs=pl.BlockSpec((None, S, D), lambda b: (b, 0, 0)),
        ),
        compiler_params=pltpu.CompilerParams(
            dimension_semantics=("parallel",)),
        cost_estimate=cost,
    )(x, enc_s)


if __name__ == "__main__":
    # Case 1: the module's toy shape (D=32 < 128 -> lane-dense flattened layout).
    d_model = 32
    max_len = 16
    B, S = 2, 8

    key = jax.random.PRNGKey(0)
    x = jax.random.normal(key, (B, S, d_model), dtype=jnp.float32)
    encoding = make_positional_encoding(d_model, max_len)

    out = jax.block_until_ready(positional_encoding_forward(x, encoding))
    ref = x + encoding[None, :S, :]
    assert out.shape == (B, S, d_model)
    assert jnp.allclose(out, ref, atol=1e-6), "mismatch vs reference (layout 2)"

    # Case 2: a lane-dense d_model (D % 128 == 0 -> row-tiled layout).
    d_model2, max_len2, B2, S2 = 128, 32, 2, 16
    x2 = jax.random.normal(jax.random.PRNGKey(0), (B2, S2, d_model2), dtype=jnp.float32)
    encoding2 = make_positional_encoding(d_model2, max_len2)
    out2 = jax.block_until_ready(positional_encoding_forward(x2, encoding2))
    ref2 = x2 + encoding2[None, :S2, :]
    assert out2.shape == (B2, S2, d_model2)
    assert jnp.allclose(out2, ref2, atol=1e-6), "mismatch vs reference (layout 1)"

    print("KERNEL_OK")
</pallas_src>

<mosaic_0001>
module attributes {stable_mosaic.version = 11 : i64} {
  func.func @_add_kernel(%arg0: i32, %arg1: memref<2x256xf32, #tpu.memory_space<vmem>>, %arg2: memref<1x256xf32, #tpu.memory_space<vmem>>, %arg3: memref<2x256xf32, #tpu.memory_space<vmem>>) attributes {dimension_semantics = [#tpu.dimension_semantics<parallel>], iteration_bounds = array<i64: 1>, scalar_prefetch = 0 : i64, scratch_operands = 0 : i64, tpu.core_type = #tpu.core_type<tc>, window_params = [{transform_indices = @transform_0, window_bounds = array<i64: 2, 256>}, {transform_indices = @transform_1, window_bounds = array<i64: 1, 256>}, {transform_indices = @transform_2, window_bounds = array<i64: 2, 256>}]} {
    %c0 = arith.constant 0 : index
    %c0_0 = arith.constant 0 : index
    %0 = vector.load %arg1[%c0, %c0_0] : memref<2x256xf32, #tpu.memory_space<vmem>>, vector<2x256xf32>
    %c0_1 = arith.constant 0 : index
    %c0_2 = arith.constant 0 : index
    %1 = vector.load %arg2[%c0_1, %c0_2] : memref<1x256xf32, #tpu.memory_space<vmem>>, vector<1x256xf32>
    %2 = vector.broadcast %1 : vector<1x256xf32> to vector<2x256xf32>
    %3 = arith.addf %0, %2 : vector<2x256xf32>
    %c0_3 = arith.constant 0 : index
    %c0_4 = arith.constant 0 : index
    %4 = vector.load %arg3[%c0_3, %c0_4] : memref<2x256xf32, #tpu.memory_space<vmem>>, vector<2x256xf32>
    tpu.vector_store %arg3[%c0_3, %c0_4], %3 {strides = array<i32>} : memref<2x256xf32, #tpu.memory_space<vmem>>, vector<2x256xf32>,
    return
  }
  func.func @transform_0(%arg0: i32) -> (i32, i32) {
    %c0_i32 = arith.constant 0 : i32
    %c0_i32_0 = arith.constant 0 : i32
    return %c0_i32, %arg0 : i32, i32
  }
  func.func @transform_1(%arg0: i32) -> (i32, i32) {
    %c0_i32 = arith.constant 0 : i32
    %c0_i32_0 = arith.constant 0 : i32
    return %c0_i32, %arg0 : i32, i32
  }
  func.func @transform_2(%arg0: i32) -> (i32, i32) {
    %c0_i32 = arith.constant 0 : i32
    %c0_i32_0 = arith.constant 0 : i32
    return %c0_i32, %arg0 : i32, i32
  }
}

</mosaic_0001>

<bundles_post_ra>
// kernel: tpu_custom_call.1
= control target key start
LH: loop header
LB: loop body
LE: loop exit
PB: predicated region body
PF: predicated region fallthrough
CT: control target
= control target key end

     0   :  { %7 = vsyncpa [#allocation3], 0  ;;  %s172_s0 = inlined_call_operand.hbm [shape: f32[2,256], index: 0, kind: input, shape index: {}]   ;;  %s173_s1 = inlined_call_operand.hbm [shape: f32[1,256], index: 1, kind: input, shape index: {}]   ;;  %s174_s2 = inlined_call_operand.hbm [shape: f32[2,256], index: 2, kind: output, shape index: {}]  }
   0x1   :  { %8 = vsyncpa [#allocation6], 0 }
   0x2   :  { %9 = vsyncpa [#allocation4], 0  ;;  %s144_s9 = smov [#allocation2]   ;;  %s145_s11 = smov [#allocation5]  }
   0x3   :  { %s16_s10 = sshll.u32 %s144_s9, 4  ;;  %s26_s12 = sshll.u32 %s145_s11, 4  ;;  %s17_s10 = int_to_ptr.vmem [resolvable:$true] %s16_s10  ;;  %s27_s12 = int_to_ptr.vmem [resolvable:$true] %s26_s12 }
   0x4   :  { %s86_s13 = scalar_lea.vmem %s17_s10, 64  ;;  %p91_p1 = scmp.lt.s32.totalorder %s17_s10, %s17_s10 }
   0x5   :  { %p87_p0 = scmp.ne.s32.totalorder %s17_s10, %s86_s13  ;;  %p92_p2 = scmp.lt.s32.totalorder %s86_s13, %s86_s13 }
   0x7   :  { %p93_p3 = por %p92_p2, %p91_p1 }
   0x9   :  { %p94_p4 = pnand %p93_p3, %p87_p0 }
   0xb   :  { %97 = shalt.err (!%p94_p4)
}
   0xc   :  { %19 = dma.hbm_to_vmem [thread:$0]  %s172_s0, 64, %s17_s10, [#allocation3]  }
   0xd   :  { %s106_s16 = scalar_lea.vmem %s27_s12, 32  ;;  %p111_p6 = scmp.lt.s32.totalorder %s27_s12, %s27_s12 }
   0xe   :  { %p107_p5 = scmp.ne.s32.totalorder %s27_s12, %s106_s16  ;;  %p112_p7 = scmp.lt.s32.totalorder %s106_s16, %s106_s16 }
  0x10   :  { %p113_p8 = por %p112_p7, %p111_p6 }
  0x12   :  { %p114_p9 = pnand %p113_p8, %p107_p5 }
  0x14   :  { %117 = shalt.err (!%p114_p9)
}
  0x15   :  { %29 = dma.hbm_to_vmem [thread:$0]  %s173_s1, 32, %s27_s12, [#allocation6]  }
  0x16   :  { %138 = dma.done.wait [#allocation3], 64  }
  0x17   :  { %139 = vsyncadd [#allocation3], 4294967232 }
  0x18   :  { %140 = dma.done.wait [#allocation6], 32  }
  0x19   :  { %141 = vsyncadd [#allocation6], 4294967264  ;;  %v39_v0 = vlaneseq  ;;  %v146_v1 = vmov 1983009808   ;;  %v37_v7 = vld [vmem:[#allocation5] sm:$0x3] }
  0x1a   :  { %v49_v2 = vunpack.c.l.s4 %v146_v1  ;;  %v36_v12 = vld [vmem:[#allocation2] sm:$0xf]  ;;  %s147_s0 = smov [#allocation7]  }
  0x1b   :  { %v40_v3 = vshrl.u32 %v39_v0, 7  ;;  %s64_s19 = sshll.u32 %s147_s0, 4  ;;  %s65_s19 = int_to_ptr.vmem [resolvable:$true] %s64_s19 }
  0x1c   :  { %v50_v6 = vunpack.c.0.s8 %v49_v2  ;;  %s118_s1 = scalar_lea.vmem %s65_s19, 64  ;;  %p123_p11 = scmp.lt.s32.totalorder %s65_s19, %s65_s19 }
  0x1d   :  { %v41_v4 = vsub.s32 0, %v40_v3  ;;  %v45_v5 = vsub.s32 1, %v40_v3  ;;  %p119_p10 = scmp.ne.s32.totalorder %s65_s19, %s118_s1  ;;  %p124_p12 = scmp.lt.s32.totalorder %s118_s1, %s118_s1 }
  0x1e   :  { %v53_v10 = vsub.s32 %v50_v6, %v40_v3 }
  0x1f   :  { %v42_v8 = vrot.slane %v37_v7, %v41_v4  ;;  %v46_v9 = vrot.slane %v37_v7, %v45_v5  ;;  %p125_p13 = por %p124_p12, %p123_p11 }
  0x21   :  { %v47_v11 = vcombine.low %v42_v8, %v46_v9  ;;  %p126_p0 = pnand %p125_p13, %p119_p10 }
  0x23   :  { %v54_v13 = vrot.slane %v47_v11, %v53_v10 }
  0x25   :  { %v56_v14 = vadd.f32 %v54_v13, %v36_v12 }
  0x27   :  { %57 = vst [vmem:[#allocation7] sm:$0xf] %v56_v14 }
  0x28   :  { %129 = shalt.err (!%p126_p0)
}
  0x29   :  { %67 = dma.vmem_to_hbm [thread:$0]  %s65_s19, 64, %s174_s2, [#allocation4]  }
  0x2a   :  { %142 = dma.done.wait [#allocation4], 64  }
  0x2b   :  { %143 = vsyncadd [#allocation4], 4294967232 }
  0x2c   :  { %71 = vsyncpa [#allocation3], 1 }
  0x2d   :  { %72 = vsyncpa [#allocation6], 1 }
  0x2e   :  { %73 = vsyncpa [#allocation4], 1 }

</bundles_post_ra>
